<compile_context>
chip_gen: v6e
topology: v6e:2x2x1
jax: 0.10.0
libtpu: 0.0.40
codegen_flags: <defaults>
</compile_context>

<pallas_src>
import jax
import jax.numpy as jnp
from jax.experimental import pallas as pl
from jax.experimental.pallas import tpu as pltpu

_EPS = 1e-5  # PyTorch LayerNorm default


def _round_up(n, m):
    return ((n + m - 1) // m) * m


def _default_vmem_limit():
    """~80% of physical VMEM (51 MiB on 64-MiB v7x, ~102 MiB on 128-MiB
    v5e/v6e); conservative 48 MiB fallback if the query is unavailable."""
    try:
        cap = getattr(pltpu.get_tpu_info(), "vmem_capacity_bytes", None)
        if cap:
            return int(min(cap * 0.8, cap - (8 << 20)))
    except Exception:
        pass
    return 48 * 1024 * 1024


def critic_kernel(x_ref, w1_ref, p1_ref, w2_ref, p2_ref, o_ref):
    # ---- Layer 1: Linear (bf16 MXU, f32 acc) -> LayerNorm -> LeakyReLU ----
    x = x_ref[...].astype(jnp.bfloat16)
    p1 = p1_ref[...]                                  # (3, 2H): bias, gamma, beta
    h = jnp.dot(x, w1_ref[...], preferred_element_type=jnp.float32) + p1[0:1, :]
    mu = jnp.mean(h, axis=-1, keepdims=True)
    hc = h - mu
    var = jnp.mean(hc * hc, axis=-1, keepdims=True)
    h = hc * jax.lax.rsqrt(var + _EPS) * p1[1:2, :] + p1[2:3, :]
    h = jnp.maximum(h, 0.2 * h)

    # ---- Layer 2: Linear -> LayerNorm -> LeakyReLU ----
    p2 = p2_ref[...]                                  # (5, H): b2, g2, be2, w3, b3
    h = jnp.dot(h.astype(jnp.bfloat16), w2_ref[...],
                preferred_element_type=jnp.float32) + p2[0:1, :]
    mu = jnp.mean(h, axis=-1, keepdims=True)
    hc = h - mu
    var = jnp.mean(hc * hc, axis=-1, keepdims=True)
    h = hc * jax.lax.rsqrt(var + _EPS) * p2[1:2, :] + p2[2:3, :]
    h = jnp.maximum(h, 0.2 * h)

    # ---- Layer 3: (1,H)·(tb,H)^T -> lane-dense (1, tb) score row ----
    out = jax.lax.dot_general(p2[3:4, :], h,
                              dimension_numbers=(((1,), (1,)), ((), ())),
                              preferred_element_type=jnp.float32)
    o_ref[...] = (out + p2[4:5, 0:1]).astype(o_ref.dtype)


def critic_forward(x, params, *, tb=512, vmem_limit_bytes=None):
    """x: [B, input_dim] (f32 or bf16). Returns [B, 1] float32."""
    w1, p1, w2, p2 = params
    B, Din = x.shape
    H2 = w1.shape[1]
    H = w2.shape[1]

    # Tile selection: big tiles amortize the ~0.35us/step overhead, but cap at
    # ~B rounded to 128 so small batches don't over-pad and large batches keep
    # >= 2 grid steps for megacore / 2-TC sharding.
    tb_eff = max(128, min(tb, _round_up(B, 128)))
    grid = pl.cdiv(B, tb_eff)
    Bp = grid * tb_eff
    if Bp != B:
        # Padded zero rows stay finite through LN (constant row -> beta) and
        # are sliced off below.
        x = jnp.pad(x, ((0, Bp - B), (0, 0)))

    if vmem_limit_bytes is None:
        vmem_limit_bytes = _default_vmem_limit()

    # Grid-invariant operands: constant index_map + single buffering.
    def const_spec(shape):
        return pl.BlockSpec(shape, lambda i: (0, 0), pipeline_mode=pl.Buffered(1))

    out = pl.pallas_call(
        critic_kernel,
        out_shape=jax.ShapeDtypeStruct((1, Bp), jnp.float32),
        grid_spec=pltpu.PrefetchScalarGridSpec(
            num_scalar_prefetch=0,
            grid=(grid,),
            in_specs=[
                pl.BlockSpec((tb_eff, Din), lambda i: (i, 0)),   # x tile
                const_spec((Din, H2)),                           # w1 (bf16)
                const_spec((3, H2)),                             # b1/g1/be1
                const_spec((H2, H)),                             # w2 (bf16)
                const_spec((5, H)),                              # b2/g2/be2/w3/b3
            ],
            # Lane-dense output row: one unmasked (1, tb) store per tile.
            out_specs=pl.BlockSpec((1, tb_eff), lambda i: (0, i)),
        ),
        compiler_params=pltpu.CompilerParams(
            dimension_semantics=("parallel",),   # batch axis is independent
            vmem_limit_bytes=vmem_limit_bytes,
        ),
    )(x, w1, p1, w2, p2)
    return out.reshape(Bp, 1)[:B]


def init_params(key, input_dim, hidden_dim):
    """Matches PyTorch init: kaiming_normal_ weights (fan_in, gain sqrt(2)),
    zero biases, LayerNorm gamma=1 / beta=0. The two big weight matrices are
    stored in bf16; LN params and the packed head stay f32."""
    k1, k2, k3 = jax.random.split(key, 3)
    H2, H = hidden_dim * 2, hidden_dim

    def kaiming(k, fan_in, fan_out):
        std = (2.0 / fan_in) ** 0.5
        return jax.random.normal(k, (fan_in, fan_out), jnp.float32) * std

    w1 = kaiming(k1, input_dim, H2).astype(jnp.bfloat16)
    p1 = jnp.stack([jnp.zeros((H2,), jnp.float32),   # bias1
                    jnp.ones((H2,), jnp.float32),    # gamma1
                    jnp.zeros((H2,), jnp.float32)])  # beta1

    w2 = kaiming(k2, H2, H).astype(jnp.bfloat16)
    w3_row = kaiming(k3, H, 1)[:, 0]                 # (H,) f32
    b3_row = jnp.zeros((H,), jnp.float32)            # scalar b3 broadcast row
    p2 = jnp.stack([jnp.zeros((H,), jnp.float32),    # bias2
                    jnp.ones((H,), jnp.float32),     # gamma2
                    jnp.zeros((H,), jnp.float32),    # beta2
                    w3_row,                          # head weight
                    b3_row])                         # head bias

    return (w1, p1, w2, p2)


def critic_ref(x, params):
    """Pure-JAX reference with the same numerics (bf16 matmul inputs,
    f32 accumulation, f32 LayerNorm)."""
    w1, p1, w2, p2 = params

    def ln_lrelu(h, p):
        mu = jnp.mean(h, axis=-1, keepdims=True)
        hc = h - mu
        var = jnp.mean(hc * hc, axis=-1, keepdims=True)
        h = hc * jax.lax.rsqrt(var + _EPS) * p[1:2, :] + p[2:3, :]
        return jnp.maximum(h, 0.2 * h)

    h = jnp.dot(x.astype(jnp.bfloat16), w1,
                preferred_element_type=jnp.float32) + p1[0:1, :]
    h = ln_lrelu(h, p1)
    h = jnp.dot(h.astype(jnp.bfloat16), w2,
                preferred_element_type=jnp.float32) + p2[0:1, :]
    h = ln_lrelu(h, p2)
    return jnp.dot(h, p2[3, :])[:, None] + p2[4, 0]


if __name__ == "__main__":
    key = jax.random.PRNGKey(0)
    kx, kp = jax.random.split(key)

    # Small shapes; batch is intentionally NOT a multiple of the tile to
    # exercise padding, and tb=128 here forces a 2-step parallel grid.
    batch, input_dim, hidden_dim = 200, 64, 64
    x = jax.random.normal(kx, (batch, input_dim), jnp.float32)
    params = init_params(kp, input_dim, hidden_dim)

    out = jax.block_until_ready(critic_forward(x, params, tb=128))
    ref = critic_ref(x, params)

    assert out.shape == (batch, 1)
    assert bool(jnp.all(jnp.isfinite(out)))
    assert jnp.allclose(out, ref, atol=1e-2, rtol=1e-2), \
        float(jnp.max(jnp.abs(out - ref)))

    print("KERNEL_OK")
</pallas_src>

<mosaic_0001>
module attributes {stable_mosaic.version = 11 : i64} {
  func.func @critic_kernel(%arg0: i32, %arg1: memref<128x64xf32, #tpu.memory_space<vmem>>, %arg2: memref<64x128xbf16, #tpu.memory_space<vmem>>, %arg3: memref<3x128xf32, #tpu.memory_space<vmem>>, %arg4: memref<128x64xbf16, #tpu.memory_space<vmem>>, %arg5: memref<5x64xf32, #tpu.memory_space<vmem>>, %arg6: memref<1x128xf32, #tpu.memory_space<vmem>>) attributes {dimension_semantics = [#tpu.dimension_semantics<parallel>], iteration_bounds = array<i64: 2>, scalar_prefetch = 0 : i64, scratch_operands = 0 : i64, tpu.core_type = #tpu.core_type<tc>, window_params = [{transform_indices = @transform_0, window_bounds = array<i64: 128, 64>}, {pipeline_mode = #tpu.pipeline_mode<synchronous>, transform_indices = @transform_1, window_bounds = array<i64: 64, 128>}, {pipeline_mode = #tpu.pipeline_mode<synchronous>, transform_indices = @transform_2, window_bounds = array<i64: 3, 128>}, {pipeline_mode = #tpu.pipeline_mode<synchronous>, transform_indices = @transform_3, window_bounds = array<i64: 128, 64>}, {pipeline_mode = #tpu.pipeline_mode<synchronous>, transform_indices = @transform_4, window_bounds = array<i64: 5, 64>}, {transform_indices = @transform_5, window_bounds = array<i64: 1, 128>}]} {
    %c0 = arith.constant 0 : index
    %c0_0 = arith.constant 0 : index
    %0 = vector.load %arg1[%c0, %c0_0] : memref<128x64xf32, #tpu.memory_space<vmem>>, vector<128x64xf32>
    %1 = arith.truncf %0 : vector<128x64xf32> to vector<128x64xbf16>
    %c0_1 = arith.constant 0 : index
    %c0_2 = arith.constant 0 : index
    %2 = vector.load %arg3[%c0_1, %c0_2] : memref<3x128xf32, #tpu.memory_space<vmem>>, vector<3x128xf32>
    %c0_3 = arith.constant 0 : index
    %c0_4 = arith.constant 0 : index
    %3 = vector.load %arg2[%c0_3, %c0_4] : memref<64x128xbf16, #tpu.memory_space<vmem>>, vector<64x128xbf16>
    %cst = arith.constant dense<0.000000e+00> : vector<128x128xf32>
    %4 = tpu.matmul %1, %3, %cst {dimension_numbers = #tpu.dot_dimension_numbers<[1], [0], [0], [1], [0, 0, 1, 1], [], []>} : vector<128x64xbf16>, vector<64x128xbf16>, vector<128x128xf32> -> vector<128x128xf32>
    %5 = vector.extract_strided_slice %2 {offsets = [0, 0], sizes = [1, 128], strides = [1, 1]} : vector<3x128xf32> to vector<1x128xf32>
    %6 = vector.broadcast %5 : vector<1x128xf32> to vector<128x128xf32>
    %7 = arith.addf %4, %6 : vector<128x128xf32>
    %cst_5 = arith.constant dense<0.000000e+00> : vector<128xf32>
    %8 = vector.multi_reduction <add>, %7, %cst_5 [1] : vector<128x128xf32> to vector<128xf32>
    %9 = vector.shape_cast %8 : vector<128xf32> to vector<128x1xf32>
    %cst_6 = arith.constant 1.280000e+02 : f32
    %10 = vector.broadcast %cst_6 : f32 to vector<128x1xf32>
    %11 = arith.divf %9, %10 : vector<128x1xf32>
    %12 = vector.broadcast %11 : vector<128x1xf32> to vector<128x128xf32>
    %13 = arith.subf %7, %12 : vector<128x128xf32>
    %14 = arith.mulf %13, %13 : vector<128x128xf32>
    %cst_7 = arith.constant dense<0.000000e+00> : vector<128xf32>
    %15 = vector.multi_reduction <add>, %14, %cst_7 [1] : vector<128x128xf32> to vector<128xf32>
    %16 = vector.shape_cast %15 : vector<128xf32> to vector<128x1xf32>
    %cst_8 = arith.constant 1.280000e+02 : f32
    %17 = vector.broadcast %cst_8 : f32 to vector<128x1xf32>
    %18 = arith.divf %16, %17 : vector<128x1xf32>
    %cst_9 = arith.constant 9.99999974E-6 : f32
    %19 = vector.broadcast %cst_9 : f32 to vector<128x1xf32>
    %20 = arith.addf %18, %19 : vector<128x1xf32>
    %21 = math.rsqrt %20 : vector<128x1xf32>
    %22 = vector.broadcast %21 : vector<128x1xf32> to vector<128x128xf32>
    %23 = arith.mulf %13, %22 : vector<128x128xf32>
    %24 = vector.extract_strided_slice %2 {offsets = [1, 0], sizes = [1, 128], strides = [1, 1]} : vector<3x128xf32> to vector<1x128xf32>
    %25 = vector.broadcast %24 : vector<1x128xf32> to vector<128x128xf32>
    %26 = arith.mulf %23, %25 : vector<128x128xf32>
    %27 = vector.extract_strided_slice %2 {offsets = [2, 0], sizes = [1, 128], strides = [1, 1]} : vector<3x128xf32> to vector<1x128xf32>
    %28 = vector.broadcast %27 : vector<1x128xf32> to vector<128x128xf32>
    %29 = arith.addf %26, %28 : vector<128x128xf32>
    %cst_10 = arith.constant 2.000000e-01 : f32
    %30 = vector.broadcast %cst_10 : f32 to vector<128x128xf32>
    %31 = arith.mulf %30, %29 : vector<128x128xf32>
    %32 = arith.maximumf %29, %31 : vector<128x128xf32>
    %c0_11 = arith.constant 0 : index
    %c0_12 = arith.constant 0 : index
    %33 = vector.load %arg5[%c0_11, %c0_12] : memref<5x64xf32, #tpu.memory_space<vmem>>, vector<5x64xf32>
    %34 = arith.truncf %32 : vector<128x128xf32> to vector<128x128xbf16>
    %c0_13 = arith.constant 0 : index
    %c0_14 = arith.constant 0 : index
    %35 = vector.load %arg4[%c0_13, %c0_14] : memref<128x64xbf16, #tpu.memory_space<vmem>>, vector<128x64xbf16>
    %cst_15 = arith.constant dense<0.000000e+00> : vector<128x64xf32>
    %36 = tpu.matmul %34, %35, %cst_15 {dimension_numbers = #tpu.dot_dimension_numbers<[1], [0], [0], [1], [0, 0, 1, 1], [], []>} : vector<128x128xbf16>, vector<128x64xbf16>, vector<128x64xf32> -> vector<128x64xf32>
    %37 = vector.extract_strided_slice %33 {offsets = [0, 0], sizes = [1, 64], strides = [1, 1]} : vector<5x64xf32> to vector<1x64xf32>
    %38 = vector.broadcast %37 : vector<1x64xf32> to vector<128x64xf32>
    %39 = arith.addf %36, %38 : vector<128x64xf32>
    %cst_16 = arith.constant dense<0.000000e+00> : vector<128xf32>
    %40 = vector.multi_reduction <add>, %39, %cst_16 [1] : vector<128x64xf32> to vector<128xf32>
    %41 = vector.shape_cast %40 : vector<128xf32> to vector<128x1xf32>
    %cst_17 = arith.constant 6.400000e+01 : f32
    %42 = vector.broadcast %cst_17 : f32 to vector<128x1xf32>
    %43 = arith.divf %41, %42 : vector<128x1xf32>
    %44 = vector.broadcast %43 : vector<128x1xf32> to vector<128x64xf32>
    %45 = arith.subf %39, %44 : vector<128x64xf32>
    %46 = arith.mulf %45, %45 : vector<128x64xf32>
    %cst_18 = arith.constant dense<0.000000e+00> : vector<128xf32>
    %47 = vector.multi_reduction <add>, %46, %cst_18 [1] : vector<128x64xf32> to vector<128xf32>
    %48 = vector.shape_cast %47 : vector<128xf32> to vector<128x1xf32>
    %cst_19 = arith.constant 6.400000e+01 : f32
    %49 = vector.broadcast %cst_19 : f32 to vector<128x1xf32>
    %50 = arith.divf %48, %49 : vector<128x1xf32>
    %cst_20 = arith.constant 9.99999974E-6 : f32
    %51 = vector.broadcast %cst_20 : f32 to vector<128x1xf32>
    %52 = arith.addf %50, %51 : vector<128x1xf32>
    %53 = math.rsqrt %52 : vector<128x1xf32>
    %54 = vector.broadcast %53 : vector<128x1xf32> to vector<128x64xf32>
    %55 = arith.mulf %45, %54 : vector<128x64xf32>
    %56 = vector.extract_strided_slice %33 {offsets = [1, 0], sizes = [1, 64], strides = [1, 1]} : vector<5x64xf32> to vector<1x64xf32>
    %57 = vector.broadcast %56 : vector<1x64xf32> to vector<128x64xf32>
    %58 = arith.mulf %55, %57 : vector<128x64xf32>
    %59 = vector.extract_strided_slice %33 {offsets = [2, 0], sizes = [1, 64], strides = [1, 1]} : vector<5x64xf32> to vector<1x64xf32>
    %60 = vector.broadcast %59 : vector<1x64xf32> to vector<128x64xf32>
    %61 = arith.addf %58, %60 : vector<128x64xf32>
    %cst_21 = arith.constant 2.000000e-01 : f32
    %62 = vector.broadcast %cst_21 : f32 to vector<128x64xf32>
    %63 = arith.mulf %62, %61 : vector<128x64xf32>
    %64 = arith.maximumf %61, %63 : vector<128x64xf32>
    %65 = vector.extract_strided_slice %33 {offsets = [3, 0], sizes = [1, 64], strides = [1, 1]} : vector<5x64xf32> to vector<1x64xf32>
    %cst_22 = arith.constant dense<0.000000e+00> : vector<1x128xf32>
    %66 = tpu.matmul %65, %64, %cst_22 {dimension_numbers = #tpu.dot_dimension_numbers<[1], [1], [0], [0], [0, 0, 1, 0], [], []>} : vector<1x64xf32>, vector<128x64xf32>, vector<1x128xf32> -> vector<1x128xf32>
    %67 = vector.extract_strided_slice %33 {offsets = [4, 0], sizes = [1, 1], strides = [1, 1]} : vector<5x64xf32> to vector<1x1xf32>
    %68 = vector.broadcast %67 : vector<1x1xf32> to vector<1x128xf32>
    %69 = arith.addf %66, %68 : vector<1x128xf32>
    %c0_23 = arith.constant 0 : index
    %c0_24 = arith.constant 0 : index
    %70 = vector.load %arg6[%c0_23, %c0_24] : memref<1x128xf32, #tpu.memory_space<vmem>>, vector<1x128xf32>
    tpu.vector_store %arg6[%c0_23, %c0_24], %69 {strides = array<i32>} : memref<1x128xf32, #tpu.memory_space<vmem>>, vector<1x128xf32>,
    return
  }
  func.func @transform_0(%arg0: i32) -> (i32, i32) {
    %c0_i32 = arith.constant 0 : i32
    %c0_i32_0 = arith.constant 0 : i32
    return %arg0, %c0_i32 : i32, i32
  }
  func.func @transform_1(%arg0: i32) -> (i32, i32) {
    %c0_i32 = arith.constant 0 : i32
    %c0_i32_0 = arith.constant 0 : i32
    %c0_i32_1 = arith.constant 0 : i32
    return %c0_i32, %c0_i32_0 : i32, i32
  }
  func.func @transform_2(%arg0: i32) -> (i32, i32) {
    %c0_i32 = arith.constant 0 : i32
    %c0_i32_0 = arith.constant 0 : i32
    %c0_i32_1 = arith.constant 0 : i32
    return %c0_i32, %c0_i32_0 : i32, i32
  }
  func.func @transform_3(%arg0: i32) -> (i32, i32) {
    %c0_i32 = arith.constant 0 : i32
    %c0_i32_0 = arith.constant 0 : i32
    %c0_i32_1 = arith.constant 0 : i32
    return %c0_i32, %c0_i32_0 : i32, i32
  }
  func.func @transform_4(%arg0: i32) -> (i32, i32) {
    %c0_i32 = arith.constant 0 : i32
    %c0_i32_0 = arith.constant 0 : i32
    %c0_i32_1 = arith.constant 0 : i32
    return %c0_i32, %c0_i32_0 : i32, i32
  }
  func.func @transform_5(%arg0: i32) -> (i32, i32) {
    %c0_i32 = arith.constant 0 : i32
    %c0_i32_0 = arith.constant 0 : i32
    return %c0_i32, %arg0 : i32, i32
  }
}

</mosaic_0001>

<bundles_post_ra>
// kernel: tpu_custom_call.1
= control target key start
LH: loop header
LB: loop body
LE: loop exit
PB: predicated region body
PF: predicated region fallthrough
CT: control target
= control target key end

     0   :  { %10 = vsyncpa [#allocation3], 0  ;;  %s2264_s0 = inlined_call_operand.vmem [shape: f32[256,64], index: 0, kind: input, shape index: {}]   ;;  %s2265_s1 = inlined_call_operand.vmem [shape: bf16[64,128], index: 1, kind: input, shape index: {}]   ;;  %s2266_s2 = inlined_call_operand.vmem [shape: f32[3,128], index: 2, kind: input, shape index: {}]   ;;  %s2267_s3 = inlined_call_operand.vmem [shape: bf16[128,64], index: 3, kind: input, shape index: {}]   ;;  %s2268_s4 = inlined_call_operand.vmem [shape: f32[5,64], index: 4, kind: input, shape index: {}]   ;;  %s2269_s5 = inlined_call_operand.hbm [shape: f32[1,256], index: 5, kind: output, shape index: {}]  }
   0x1   :  { %12 = vsyncpa [#allocation3 + $0x1], 0  ;;  %s1705_s18 = smov 0   ;;  %s1707_s19 = smov 0  }
   0x2   :  { %s1709_s20 = smov 0   ;;  %s1711_s21 = smov 0  }
   0x3 LB: > { %s1307_s22 = sadd.s32 4294967295, %s1669_s21   ;;  %s1308_s23 = sadd.s32 4294967294, %s1669_s21   ;;  %s1669_s21 = sphi %s1711_s21, %s2275_s21   ;;  %s1665_s20 = sphi %s1709_s20, %s2274_s20   ;;  %s1661_s19 = sphi %s1707_s19, %s2273_s19   ;;  %s1657_s18 = sphi %s1705_s18, %s2272_s18  }
   0x4   : > { %s1728_s24 = sadd.s32 1, %s1669_s21   ;;  %s135_s25 = sadd.s32 1, %s1665_s20 }
   0x5   : > { %s132_s26 = ssub.s32 %s1669_s21, %s1728_s24  ;;  %p145_p0 = scmp.ne.s32.totalorder %s1665_s20, %s1661_s19 }
   0x6   : > { %p133_p1 = scmp.eq.s32.totalorder %s132_s26, 0  ;;  %p146_p2 = scmp.eq.s32.totalorder %s1307_s22, 1 }
   0x7   : > { %p151_p3 = scmp.ne.s32.totalorder %s1661_s19, %s1657_s18  ;;  %p152_p4 = scmp.eq.s32.totalorder %s1308_s23, 1 }
   0x8   : > { %s1738_s27 = scalar_select %p133_p1, %s1665_s20, %s135_s25  }
   0x9   : > { %p1740_p5 = por %p146_p2, %p145_p0  ;;  %p1744_p6 = por %p152_p4, %p151_p3 }
   0xa   : > { %p1311_p7 = scmp.ge.s32.totalorder %s1669_s21, 1  ;;  %p191_p8 = scmp.lt.s32.totalorder %s1669_s21, 3 }
   0xc   : > { %p192_p9 = pnand %p1311_p7, %p191_p8 }
   0xd   : > { %s1753_s7 = sshll.u32 (!%p192_p9), %s1307_s22, 4  ;;  %s216_s6 = sand.u32 (!%p192_p9), 1, %s1661_s19  }
   0xe   : > { %195 = sbr.rel (%p192_p9) target bundleno = 1359 (0x54f), region = 40  ;;  %p219_p10 = scmp.lt.s32.totalorder (!%p192_p9), %s1753_s7, 31 }
   0xf   : > { %s217_s8 = scalar_lea.vmem (!%p192_p9), [#allocation2], %s216_s6  ;;  %s2229_s12 = scalar_lea.hbm (!%p192_p9), %s2269_s5, %s1753_s7 }
  0x10   : > { %s1253_s9 = sshll.u32 (!%p192_p9), %s217_s8, 4  ;;  %s1674_s15 = smov (!%p192_p9), [#allocation2]   ;;  %s1254_s9 = int_to_ptr.vmem [resolvable:$true] %s1253_s9 }
  0x11   : > { %s1609_s14 = scalar_lea.vmem (!%p192_p9), %s1254_s9, 16 }
  0x12   : > { %p1610_p11 = scmp.ne.s32.totalorder (!%p192_p9), %s1254_s9, %s1609_s14 }
  0x13   : > { %v1533_v0 = vld [vmem:[%s2265_s1 + $0x18] sm:$0xff]   ;;  %v1534_v1 = vld [vmem:[%s2265_s1 + $0x10] sm:$0xff]   ;;  %s220_s10 = scalar_select %p219_p10, %s1753_s7, 31  ;;  %v1535_v2 = vld [vmem:[%s2265_s1 + $0x8] sm:$0xff]   ;;  %vm286_vm0 = vcmask 523264   ;;  %v258_v28 = vlaneseq  ;;  %vm1672_vm1 = vmmov 0  }
  0x14   : > { %1399 = vmatprep.subr.bf16.mxu1 %v1533_v0  ;;  %v1536_v5 = vld [vmem:[%s2265_s1] sm:$0xff]   ;;  %p1611_p12 = pnand %p1610_p11, %p1740_p5 }
  0x15   : > { %1400 = vmatpush3.bf16.msra.mxu1 %v1533_v0  ;;  %s1313_s13 = sshll.u32 %s220_s10, 3  ;;  %v1795_v29 = vshrl.u32 %v258_v28, 7  ;;  %v1801_v31 = vld [vmem:[%s2266_s2] sm:$0x7] }
  0x16   : > { %1401 = vmatprep.subr.bf16.mxu1 %v1534_v1  ;;  %s1766_s16 = scalar_lea.vmem %s2264_s0, %s1313_s13  ;;  %s1241_s13 = scalar_lea.sflag [#allocation3], %s216_s6 }
  0x17   : > { %v225_v3 = vld [vmem:[%s1766_s16] sm:$0xff]  ;;  %v226_v4 = vld [vmem:[%s1766_s16 + $0x8] sm:$0xff]  ;;  %v227_v7 = vld [vmem:[%s1766_s16 + $0x10] sm:$0xff]  ;;  %v260_v30 = vsub.s32 0, %v1795_v29  ;;  %p1612_p13 = pneg %p1611_p12 }
  0x18   : > { %v241_v6 = vpack.c.bf16 %v226_v4, %v225_v3  ;;  %v228_v8 = vld [vmem:[%s1766_s16 + $0x18] sm:$0xff]  ;;  %v229_v9 = vld [vmem:[%s1766_s16 + $0x20] sm:$0xff]  ;;  %v230_v10 = vld [vmem:[%s1766_s16 + $0x28] sm:$0xff] }
  0x19   : > { %1402 = vmatpush3.bf16.msra.mxu1 %v1534_v1  ;;  %v242_v11 = vpack.c.bf16 %v228_v8, %v227_v7  ;;  %v243_v12 = vpack.c.bf16 %v230_v10, %v229_v9  ;;  %v231_v13 = vld [vmem:[%s1766_s16 + $0x30] sm:$0xff]  ;;  %v232_v14 = vld [vmem:[%s1766_s16 + $0x38] sm:$0xff]  ;;  %v233_v15 = vld [vmem:[%s1766_s16 + $0x40] sm:$0xff]  ;;  %v261_v32 = vrot.slane %v1801_v31, %v260_v30 }
  0x1a   : > { %1403 = vmatprep.subr.bf16.mxu1 %v1535_v2  ;;  %1407 = vmatprep.mubr.msk.bf16.mxu1 %vm286_vm0, %v241_v6  ;;  %v234_v16 = vld [vmem:[%s1766_s16 + $0x48] sm:$0xff]  ;;  %v244_v17 = vpack.c.bf16 %v232_v14, %v231_v13  ;;  %v235_v19 = vld [vmem:[%s1766_s16 + $0x50] sm:$0xff]  ;;  %v236_v20 = vld [vmem:[%s1766_s16 + $0x58] sm:$0xff] }
  0x1b   : > { %v245_v18 = vpack.c.bf16 %v234_v16, %v233_v15  ;;  %v237_v21 = vld [vmem:[%s1766_s16 + $0x60] sm:$0xff]  ;;  %v238_v22 = vld [vmem:[%s1766_s16 + $0x68] sm:$0xff]  ;;  %v246_v23 = vpack.c.bf16 %v236_v20, %v235_v19  ;;  %v239_v25 = vld [vmem:[%s1766_s16 + $0x70] sm:$0xff] }
  0x1c   : > { %v247_v24 = vpack.c.bf16 %v238_v22, %v237_v21  ;;  %v240_v26 = vld [vmem:[%s1766_s16 + $0x78] sm:$0xff]  ;;  %s1613_s16 = sshll.u32 %s1674_s15, 4  ;;  %s1614_s16 = int_to_ptr.vmem [resolvable:$false] %s1613_s16 }
  0x1d   : > { %1404 = vmatpush3.bf16.msra.mxu1 %v1535_v2  ;;  %v248_v27 = vpack.c.bf16 %v240_v26, %v239_v25  ;;  %s1615_s17 = scalar_lea.vmem %s1614_s16, 32  ;;  %p1616_p0 = scmp.lt.s32.totalorder %s1254_s9, %s1614_s16 }
  0x1e   : > { %1405 = vmatprep.subr.bf16.mxu1 %v1536_v5  ;;  %p1617_p1 = scmp.lt.s32.totalorder %s1615_s17, %s1609_s14 }
  0x20   : > { %p1618_p2 = por %p1617_p1, %p1616_p0 }
  0x21   : > { %1406 = vmatpush3.bf16.msra.mxu1 %v1536_v5 }
  0x22   : > { %p1619_p3 = pnand %p1618_p2, %p1612_p13 }
  0x24   : > { %1408 = vmatmul.mubr.msk.bf16.vlgmr.msra.gmra.mxu1 %vm286_vm0, %v242_v11 }
  0x25   : > { %1411 = vmatprep.mubr.msk.bf16.mxu1 %vm286_vm0, %v243_v12 }
  0x2c   : > { %1412 = vmatmul.mubr.msk.bf16.gmra.mxu1 %vm286_vm0, %v244_v17 }
  0x2d   : > { %1415 = vmatprep.mubr.msk.bf16.mxu1 %vm286_vm0, %v245_v18 }
  0x34   : > { %1416 = vmatmul.mubr.msk.bf16.gmra.mxu1 %vm286_vm0, %v246_v23 }
  0x35   : > { %1419 = vmatprep.mubr.msk.bf16.mxu1 %vm286_vm0, %v247_v24 }
  0x3c   : > { %1420 = vmatmul.mubr.msk.bf16.gmra.mxu1 %vm286_vm0, %v248_v27 }
  0xe4   : > { %v1409_v33 = vpop.f32.mrf.mxu1 }
  0xe5   : > { %v354_v34 = vadd.f32 %v1409_v33, %v261_v32 }
  0xe6   : > { %v345_v35 = vpop.f32.mrf.mxu1 }
  0xe7   : > { %v346_v36 = vadd.f32 %v345_v35, %v261_v32  ;;  %412 = vadd.xlane.f32.xlu1 %v354_v34 }
  0xe8   : > { %v1410_v37 = vpop.f32.mrf.mxu1 }
  0xe9   : > { %v357_v38 = vadd.f32 %v1410_v37, %v261_v32  ;;  %408 = vadd.xlane.f32.xlu0 %v346_v36 }
  0xea   : > { %v348_v39 = vpop.f32.mrf.mxu1 }
  0xeb   : > { %v349_v40 = vadd.f32 %v348_v39, %v261_v32  ;;  %414 = vadd.xlane.f32.xlu1 %v357_v38 }
  0xec   : > { %v1413_v41 = vpop.f32.mrf.mxu1 }
  0xed   : > { %410 = vadd.xlane.f32.xlu0 %v349_v40  ;;  %v370_v46 = vadd.f32 %v1413_v41, %v261_v32 }
  0xee   : > { %v361_v42 = vpop.f32.mrf.mxu1 }
  0xef   : > { %v362_v43 = vadd.f32 %v361_v42, %v261_v32 }
  0xf0   : > { %v1414_v44 = vpop.f32.mrf.mxu1 }
  0xf1   : > { %416 = vadd.xlane.f32.xlu0 %v362_v43  ;;  %v373_v50 = vadd.f32 %v1414_v44, %v261_v32  ;;  %v1537_v44 = vld [vmem:[%s2267_s3 + $0x38] sm:$0xff]  }
  0xf2   : > { %v364_v45 = vpop.f32.mrf.mxu1  ;;  %1423 = vmatprep.subr.bf16.mxu1 %v1537_v44 }
  0xf3   : > { %v365_v47 = vadd.f32 %v364_v45, %v261_v32  ;;  %1424 = vmatpush3.bf16.msra.mxu1 %v1537_v44  ;;  %v607_v44 = vsub.s32 2, %v1795_v29 }
  0xf4   : > { %v1417_v48 = vpop.f32.mrf.mxu1 }
  0xf5   : > { %418 = vadd.xlane.f32.xlu1 %v365_v47  ;;  %420 = vadd.xlane.f32.xlu0 %v370_v46  ;;  %v1806_v54 = vadd.f32 %v1417_v48, %v261_v32 }
  0xf6   : > { %v377_v49 = vpop.f32.mrf.mxu1 }
  0xf7   : > { %v378_v51 = vadd.f32 %v377_v49, %v261_v32 }
  0xf8   : > { %v1418_v52 = vpop.f32.mrf.mxu1 }
  0xf9   : > { %422 = vadd.xlane.f32.xlu1 %v373_v50  ;;  %424 = vadd.xlane.f32.xlu0 %v378_v51  ;;  %v1812_v58 = vadd.f32 %v1418_v52, %v261_v32 }
  0xfa   : > { %v380_v53 = vpop.f32.mrf.mxu1 }
  0xfb   : > { %v1808_v55 = vadd.f32 %v380_v53, %v261_v32  ;;  %v1538_v53 = vld [vmem:[%s2267_s3 + $0x30] sm:$0xff]  }
  0xfc   : > { %v1421_v56 = vpop.f32.mrf.mxu1  ;;  %1425 = vmatprep.subr.bf16.mxu1 %v1538_v53 }
  0xfd   : > { %426 = vadd.xlane.f32.xlu1 %v1808_v55  ;;  %428 = vadd.xlane.f32.xlu0 %v1806_v54  ;;  %v1818_v62 = vadd.f32 %v1421_v56, %v261_v32 }
  0xfe   : > { %v393_v57 = vpop.f32.mrf.mxu1  ;;  %1426 = vmatpush3.bf16.msra.mxu1 %v1538_v53 }
  0xff   : > { %v1814_v59 = vadd.f32 %v393_v57, %v261_v32 }
 0x100   : > { %v1422_v60 = vpop.f32.mrf.mxu1 }
 0x101   : > { %430 = vadd.xlane.f32.xlu1 %v1812_v58  ;;  %432 = vadd.xlane.f32.xlu0 %v1814_v59  ;;  %v1824_v0 = vadd.f32 %v1422_v60, %v261_v32 }
 0x102   : > { %v396_v61 = vpop.f32.mrf.mxu1 }
 0x103   : > { %v1820_v63 = vadd.f32 %v396_v61, %v261_v32 }
 0x105   : > { %434 = vadd.xlane.f32.xlu1 %v1820_v63  ;;  %436 = vadd.xlane.f32.xlu0 %v1818_v62 }
 0x109   : > { %438 = vadd.xlane.f32.xlu1 %v1824_v0 }
 0x170   : > { %v413_v1 = vpop.xlane.xlu1 %412 }
 0x171   : > { %v443_v3 = vmul.f32 0.0078125, %v413_v1 }
 0x172   : > { %v409_v2 = vpop.xlane.xlu0 %408 }
 0x173   : > { %v441_v4 = vmul.f32 0.0078125, %v409_v2  ;;  %v1829_v8 = vsub.f32 %v354_v34, %v443_v3 }
 0x174   : > { %v415_v5 = vpop.xlane.xlu1 %414 }
 0x175   : > { %v1827_v6 = vsub.f32 %v346_v36, %v441_v4  ;;  %v444_v9 = vmul.f32 0.0078125, %v415_v5  ;;  %v475_v16 = vmul.f32 %v1829_v8, %v1829_v8 }
 0x176   : > { %v411_v7 = vpop.xlane.xlu0 %410 }
 0x177   : > { %v442_v10 = vmul.f32 0.0078125, %v411_v7  ;;  %v473_v11 = vmul.f32 %v1827_v6, %v1827_v6  ;;  %v1835_v14 = vsub.f32 %v357_v38, %v444_v9 }
 0x179   : > { %v1833_v12 = vsub.f32 %v349_v40, %v442_v10  ;;  %489 = vadd.xlane.f32.xlu0 %v473_v11  ;;  %v476_v23 = vmul.f32 %v1835_v14, %v1835_v14  ;;  %v1541_v11 = vld [vmem:[%s2267_s3 + $0x18] sm:$0xff]  }
 0x17a   : > { %v417_v13 = vpop.xlane.xlu0 %416 }
 0x17b   : > { %v445_v15 = vmul.f32 0.0078125, %v417_v13  ;;  %v474_v17 = vmul.f32 %v1833_v12, %v1833_v12  ;;  %v1542_v13 = vld [vmem:[%s2267_s3 + $0x10] sm:$0xff]  }
 0x17d   : > { %v1841_v18 = vsub.f32 %v362_v43, %v445_v15  ;;  %493 = vadd.xlane.f32.xlu0 %v475_v16  ;;  %491 = vadd.xlane.f32.xlu1 %v474_v17  ;;  %v1544_v15 = vld [vmem:[%s2267_s3] sm:$0xff]  }
 0x17e   : > { %v419_v19 = vpop.xlane.xlu1 %418  ;;  %v421_v20 = vpop.xlane.xlu0 %420 }
 0x17f   : > { %v446_v21 = vmul.f32 0.0078125, %v419_v19  ;;  %v447_v22 = vmul.f32 0.0078125, %v421_v20  ;;  %v477_v24 = vmul.f32 %v1841_v18, %v1841_v18 }
 0x181   : > { %v1847_v25 = vsub.f32 %v365_v47, %v446_v21  ;;  %v1849_v26 = vsub.f32 %v370_v46, %v447_v22  ;;  %495 = vadd.xlane.f32.xlu1 %v476_v23  ;;  %497 = vadd.xlane.f32.xlu0 %v477_v24 }
 0x182   : > { %v423_v27 = vpop.xlane.xlu1 %422  ;;  %v425_v28 = vpop.xlane.xlu0 %424 }
 0x183   : > { %v448_v32 = vmul.f32 0.0078125, %v423_v27  ;;  %v449_v33 = vmul.f32 0.0078125, %v425_v28  ;;  %v478_v34 = vmul.f32 %v1847_v25, %v1847_v25  ;;  %v479_v35 = vmul.f32 %v1849_v26, %v1849_v26 }
 0x185   : > { %v1855_v36 = vsub.f32 %v373_v50, %v448_v32  ;;  %v1857_v37 = vsub.f32 %v378_v51, %v449_v33  ;;  %499 = vadd.xlane.f32.xlu1 %v478_v34  ;;  %501 = vadd.xlane.f32.xlu0 %v479_v35 }
 0x186   : > { %v427_v38 = vpop.xlane.xlu1 %426  ;;  %v429_v39 = vpop.xlane.xlu0 %428 }
 0x187   : > { %v450_v40 = vmul.f32 0.0078125, %v427_v38  ;;  %v451_v41 = vmul.f32 0.0078125, %v429_v39  ;;  %v480_v42 = vmul.f32 %v1855_v36, %v1855_v36  ;;  %v481_v43 = vmul.f32 %v1857_v37, %v1857_v37 }
 0x189   : > { %v1867_v45 = vsub.f32 %v1808_v55, %v450_v40  ;;  %v1870_v46 = vsub.f32 %v1806_v54, %v451_v41  ;;  %503 = vadd.xlane.f32.xlu1 %v480_v42  ;;  %505 = vadd.xlane.f32.xlu0 %v481_v43  ;;  %v587_v41 = vsub.s32 1, %v1795_v29 }
 0x18a   : > { %v431_v47 = vpop.xlane.xlu1 %430  ;;  %v433_v48 = vpop.xlane.xlu0 %432 }
 0x18b   : > { %v452_v49 = vmul.f32 0.0078125, %v431_v47  ;;  %v453_v50 = vmul.f32 0.0078125, %v433_v48  ;;  %v482_v51 = vmul.f32 %v1867_v45, %v1867_v45  ;;  %v483_v52 = vmul.f32 %v1870_v46, %v1870_v46 }
 0x18d   : > { %v1880_v54 = vsub.f32 %v1812_v58, %v452_v49  ;;  %v1883_v55 = vsub.f32 %v1814_v59, %v453_v50  ;;  %507 = vadd.xlane.f32.xlu1 %v482_v51  ;;  %509 = vadd.xlane.f32.xlu0 %v483_v52  ;;  %v1539_v58 = vld [vmem:[%s2267_s3 + $0x28] sm:$0xff]   ;;  %v1927_v51 = vrot.slane %v1801_v31, %v587_v41 }
 0x18e   : > { %v435_v56 = vpop.xlane.xlu1 %434  ;;  %v437_v57 = vpop.xlane.xlu0 %436  ;;  %1427 = vmatprep.subr.bf16.mxu1 %v1539_v58 }
 0x18f   : > { %v454_v60 = vmul.f32 0.0078125, %v435_v56  ;;  %v455_v61 = vmul.f32 0.0078125, %v437_v57  ;;  %v484_v1 = vmul.f32 %v1880_v54, %v1880_v54  ;;  %v485_v2 = vmul.f32 %v1883_v55, %v1883_v55  ;;  %1428 = vmatpush3.bf16.msra.mxu1 %v1539_v58 }
 0x190   : > { %v1932_v57 = vrot.slane %v1801_v31, %v607_v44 }
 0x191   : > { %v1893_v59 = vsub.f32 %v1820_v63, %v454_v60  ;;  %v1896_v3 = vsub.f32 %v1818_v62, %v455_v61  ;;  %511 = vadd.xlane.f32.xlu1 %v484_v1  ;;  %513 = vadd.xlane.f32.xlu0 %v485_v2  ;;  %v1540_v63 = vld [vmem:[%s2267_s3 + $0x20] sm:$0xff]  }
 0x192   : > { %v439_v4 = vpop.xlane.xlu1 %438  ;;  %1429 = vmatprep.subr.bf16.mxu1 %v1540_v63 }
 0x193   : > { %v456_v5 = vmul.f32 0.0078125, %v439_v4  ;;  %v486_v7 = vmul.f32 %v1893_v59, %v1893_v59  ;;  %v487_v9 = vmul.f32 %v1896_v3, %v1896_v3  ;;  %1430 = vmatpush3.bf16.msra.mxu1 %v1540_v63 }
 0x194   : > { %1431 = vmatprep.subr.bf16.mxu1 %v1541_v11 }
 0x195   : > { %v1906_v10 = vsub.f32 %v1824_v0, %v456_v5  ;;  %515 = vadd.xlane.f32.xlu1 %v486_v7  ;;  %517 = vadd.xlane.f32.xlu0 %v487_v9  ;;  %v1543_v0 = vld [vmem:[%s2267_s3 + $0x8] sm:$0xff]  }
 0x197   : > { %v488_v62 = vmul.f32 %v1906_v10, %v1906_v10  ;;  %1432 = vmatpush3.bf16.msra.mxu1 %v1541_v11 }
 0x198   : > { %1433 = vmatprep.subr.bf16.mxu1 %v1542_v13 }
 0x199   : > { %519 = vadd.xlane.f32.xlu1 %v488_v62 }
 0x19b   : > { %1434 = vmatpush3.bf16.msra.mxu1 %v1542_v13 }
 0x19c   : > { %1435 = vmatprep.subr.bf16.mxu1 %v1543_v0 }
 0x19f   : > { %1436 = vmatpush3.bf16.msra.mxu1 %v1543_v0 }
 0x1a0   : > { %1437 = vmatprep.subr.bf16.mxu1 %v1544_v15 }
 0x1a3   : > { %1438 = vmatpush3.bf16.msra.mxu1 %v1544_v15 }
 0x202   : > { %v490_v16 = vpop.xlane.xlu0 %489 }
 0x203   : > { %v521_v17 = vmul.f32 0.0078125, %v490_v16 }
 0x205   : > { %v537_v19 = vadd.f32 1e-05, %v521_v17 }
 0x206   : > { %v492_v20 = vpop.xlane.xlu1 %491  ;;  %v494_v21 = vpop.xlane.xlu0 %493 }
 0x207   : > { %1545 = vrsqrt.f32 %v537_v19  ;;  %v522_v22 = vmul.f32 0.0078125, %v492_v20  ;;  %v523_v23 = vmul.f32 0.0078125, %v494_v21 }
 0x209   : > { %v538_v24 = vadd.f32 1e-05, %v522_v22  ;;  %v539_v27 = vadd.f32 1e-05, %v523_v23 }
 0x20a   : > { %v496_v28 = vpop.xlane.xlu1 %495  ;;  %v498_v32 = vpop.xlane.xlu0 %497 }
 0x20b   : > { %1547 = vrsqrt.f32 %v538_v24  ;;  %v524_v33 = vmul.f32 0.0078125, %v496_v28  ;;  %v525_v34 = vmul.f32 0.0078125, %v498_v32 }
 0x20c   : > { %1549 = vrsqrt.f32 %v539_v27 }
 0x20d   : > { %v540_v35 = vadd.f32 1e-05, %v524_v33  ;;  %v541_v38 = vadd.f32 1e-05, %v525_v34 }
 0x20e   : > { %v500_v39 = vpop.xlane.xlu1 %499  ;;  %v502_v40 = vpop.xlane.xlu0 %501 }
 0x20f   : > { %1551 = vrsqrt.f32 %v540_v35  ;;  %v526_v42 = vmul.f32 0.0078125, %v500_v39  ;;  %v527_v43 = vmul.f32 0.0078125, %v502_v40 }
 0x210   : > { %1553 = vrsqrt.f32 %v541_v38 }
 0x211   : > { %v542_v47 = vadd.f32 1e-05, %v526_v42  ;;  %v543_v48 = vadd.f32 1e-05, %v527_v43 }
 0x212   : > { %v504_v49 = vpop.xlane.xlu1 %503  ;;  %v506_v50 = vpop.xlane.xlu0 %505 }
 0x213   : > { %1555 = vrsqrt.f32 %v542_v47  ;;  %v528_v52 = vmul.f32 0.0078125, %v504_v49  ;;  %v529_v53 = vmul.f32 0.0078125, %v506_v50 }
 0x214   : > { %v1546_v56 = vpop.eup %1545  ;;  %1557 = vrsqrt.f32 %v543_v48 }
 0x215   : > { %v544_v60 = vadd.f32 1e-05, %v528_v52  ;;  %v545_v61 = vadd.f32 1e-05, %v529_v53  ;;  %v569_v1 = vmul.f32 %v1546_v56, %v1827_v6 }
 0x216   : > { %v508_v2 = vpop.xlane.xlu1 %507  ;;  %v510_v58 = vpop.xlane.xlu0 %509 }
 0x217   : > { %1559 = vrsqrt.f32 %v544_v60  ;;  %v530_v4 = vmul.f32 0.0078125, %v508_v2  ;;  %v531_v5 = vmul.f32 0.0078125, %v510_v58  ;;  %v589_v7 = vmul.f32 %v1927_v51, %v569_v1 }
 0x218   : > { %v1548_v9 = vpop.eup %1547  ;;  %1561 = vrsqrt.f32 %v545_v61 }
 0x219   : > { %v1550_v63 = vpop.eup %1549  ;;  %v546_v62 = vadd.f32 1e-05, %v530_v4  ;;  %v547_v11 = vadd.f32 1e-05, %v531_v5  ;;  %v570_v13 = vmul.f32 %v1548_v9, %v1833_v12  ;;  %v609_v31 = vadd.f32 %v1932_v57, %v589_v7 }
 0x21a   : > { %v571_v0 = vmul.f32 %v1550_v63, %v1829_v8  ;;  %v512_v15 = vpop.xlane.xlu1 %511  ;;  %v514_v6 = vpop.xlane.xlu0 %513 }
 0x21b   : > { %1563 = vrsqrt.f32 %v546_v62  ;;  %v532_v16 = vmul.f32 0.0078125, %v512_v15  ;;  %v533_v17 = vmul.f32 0.0078125, %v514_v6  ;;  %v590_v19 = vmul.f32 %v1927_v51, %v570_v13 }
 0x21c   : > { %v1552_v20 = vpop.eup %1551  ;;  %v591_v21 = vmul.f32 %v1927_v51, %v571_v0  ;;  %1565 = vrsqrt.f32 %v547_v11  ;;  %v625_v22 = vmul.f32 0.2, %v609_v31 }
 0x21d   : > { %v1554_v23 = vpop.eup %1553  ;;  %v572_v24 = vmul.f32 %v1552_v20, %v1835_v14  ;;  %v548_v12 = vadd.f32 1e-05, %v532_v16  ;;  %v549_v27 = vadd.f32 1e-05, %v533_v17  ;;  %v610_v28 = vadd.f32 %v1932_v57, %v590_v19 }
 0x21e   : > { %v516_v8 = vpop.xlane.xlu1 %515  ;;  %v518_v32 = vpop.xlane.xlu0 %517  ;;  %v641_v33 = vmax.f32 %v609_v31, %v625_v22  ;;  %v611_v34 = vadd.f32 %v1932_v57, %v591_v21  ;;  %v573_v35 = vmul.f32 %v1554_v23, %v1841_v18 }
 0x21f   : > { %v592_v38 = vmul.f32 %v1927_v51, %v572_v24  ;;  %1567 = vrsqrt.f32 %v548_v12  ;;  %v534_v39 = vmul.f32 0.0078125, %v516_v8  ;;  %v535_v40 = vmul.f32 0.0078125, %v518_v32 }
 0x220   : > { %v1556_v42 = vpop.eup %1555  ;;  %1569 = vrsqrt.f32 %v549_v27  ;;  %v626_v43 = vmul.f32 0.2, %v610_v28  ;;  %v627_v14 = vmul.f32 0.2, %v611_v34  ;;  %v593_v47 = vmul.f32 %v1927_v51, %v573_v35 }
 0x221   : > { %v1558_v48 = vpop.eup %1557  ;;  %v550_v49 = vadd.f32 1e-05, %v534_v39  ;;  %v551_v50 = vadd.f32 1e-05, %v535_v40  ;;  %v612_v52 = vadd.f32 %v1932_v57, %v592_v38  ;;  %v574_v53 = vmul.f32 %v1556_v42, %v1847_v25 }
 0x222   : > { %v520_v56 = vpop.xlane.xlu1 %519  ;;  %v642_v18 = vmax.f32 %v610_v28, %v626_v43  ;;  %v643_v60 = vmax.f32 %v611_v34, %v627_v14  ;;  %v613_v61 = vadd.f32 %v1932_v57, %v593_v47  ;;  %v575_v1 = vmul.f32 %v1558_v48, %v1849_v26 }
 0x223   : > { %1571 = vrsqrt.f32 %v550_v49  ;;  %v536_v2 = vmul.f32 0.0078125, %v520_v56  ;;  %v628_v58 = vmul.f32 0.2, %v612_v52  ;;  %v594_v4 = vmul.f32 %v1927_v51, %v574_v53 }
 0x224   : > { %v1560_v5 = vpop.eup %1559  ;;  %1573 = vrsqrt.f32 %v551_v50  ;;  %v658_v7 = vpack.c.bf16 %v642_v18, %v641_v33  ;;  %v629_v9 = vmul.f32 0.2, %v613_v61  ;;  %v595_v63 = vmul.f32 %v1927_v51, %v575_v1 }
 0x225   : > { %v1562_v62 = vpop.eup %1561  ;;  %v552_v25 = vadd.f32 1e-05, %v536_v2  ;;  %v644_v11 = vmax.f32 %v612_v52, %v628_v58  ;;  %v614_v13 = vadd.f32 %v1932_v57, %v594_v4  ;;  %v576_v31 = vmul.f32 %v1560_v5, %v1855_v36 }
 0x226   : > { %1439 = vmatprep.mubr.bf16.mxu1 %v658_v7  ;;  %v615_v26 = vadd.f32 %v1932_v57, %v595_v63  ;;  %v577_v0 = vmul.f32 %v1562_v62, %v1857_v37  ;;  %v645_v22 = vmax.f32 %v613_v61, %v629_v9 }
 0x227   : > { %1575 = vrsqrt.f32 %v552_v25  ;;  %v659_v15 = vpack.c.bf16 %v644_v11, %v643_v60  ;;  %v630_v6 = vmul.f32 0.2, %v614_v13  ;;  %v596_v16 = vmul.f32 %v1927_v51, %v576_v31 }
 0x228   : > { %v1564_v17 = vpop.eup %1563  ;;  %v631_v19 = vmul.f32 0.2, %v615_v26  ;;  %v597_v20 = vmul.f32 %v1927_v51, %v577_v0 }
 0x229   : > { %v1566_v21 = vpop.eup %1565  ;;  %1440 = vmatmul.mubr.bf16.vlgmr.msra.gmra.mxu1 %v659_v15  ;;  %v646_v23 = vmax.f32 %v614_v13, %v630_v6  ;;  %v616_v36 = vadd.f32 %v1932_v57, %v596_v16  ;;  %v578_v24 = vmul.f32 %v1564_v17, %v1867_v45 }
 0x22a   : > { %v617_v12 = vadd.f32 %v1932_v57, %v597_v20  ;;  %v579_v37 = vmul.f32 %v1566_v21, %v1870_v46  ;;  %v647_v33 = vmax.f32 %v615_v26, %v631_v19 }
 0x22b   : > { %v660_v27 = vpack.c.bf16 %v646_v23, %v645_v22  ;;  %v632_v28 = vmul.f32 0.2, %v616_v36  ;;  %v598_v8 = vmul.f32 %v1927_v51, %v578_v24 }
 0x22c   : > { %v1568_v32 = vpop.eup %1567  ;;  %v599_v34 = vmul.f32 %v1927_v51, %v579_v37  ;;  %v633_v40 = vmul.f32 0.2, %v617_v12 }
 0x22d   : > { %v1570_v35 = vpop.eup %1569  ;;  %1443 = vmatprep.mubr.bf16.mxu1 %v660_v27  ;;  %v648_v38 = vmax.f32 %v616_v36, %v632_v28  ;;  %v618_v39 = vadd.f32 %v1932_v57, %v598_v8  ;;  %v580_v45 = vmul.f32 %v1568_v32, %v1880_v54 }
 0x22e   : > { %v619_v42 = vadd.f32 %v1932_v57, %v599_v34  ;;  %v581_v46 = vmul.f32 %v1570_v35, %v1883_v55  ;;  %v649_v53 = vmax.f32 %v617_v12, %v633_v40 }
 0x22f   : > { %v661_v43 = vpack.c.bf16 %v648_v38, %v647_v33  ;;  %v634_v14 = vmul.f32 0.2, %v618_v39  ;;  %v600_v47 = vmul.f32 %v1927_v51, %v580_v45 }
 0x230   : > { %v1572_v48 = vpop.eup %1571  ;;  %v635_v49 = vmul.f32 0.2, %v619_v42  ;;  %v601_v50 = vmul.f32 %v1927_v51, %v581_v46 }
 0x231   : > { %v1574_v52 = vpop.eup %1573  ;;  %1444 = vmatmul.mubr.bf16.gmra.mxu1 %v661_v43  ;;  %v650_v56 = vmax.f32 %v618_v39, %v634_v14  ;;  %v620_v18 = vadd.f32 %v1932_v57, %v600_v47  ;;  %v582_v54 = vmul.f32 %v1572_v48, %v1893_v59 }
 0x232   : > { %v621_v60 = vadd.f32 %v1932_v57, %v601_v50  ;;  %v583_v55 = vmul.f32 %v1574_v52, %v1896_v3  ;;  %v651_v4 = vmax.f32 %v619_v42, %v635_v49 }
 0x233   : > { %v662_v61 = vpack.c.bf16 %v650_v56, %v649_v53  ;;  %v636_v1 = vmul.f32 0.2, %v620_v18  ;;  %v602_v2 = vmul.f32 %v1927_v51, %v582_v54 }
 0x234   : > { %v1576_v58 = vpop.eup %1575  ;;  %v603_v5 = vmul.f32 %v1927_v51, %v583_v55  ;;  %v637_v63 = vmul.f32 0.2, %v621_v60 }
 0x235   : > { %1447 = vmatprep.mubr.bf16.mxu1 %v662_v61  ;;  %v652_v7 = vmax.f32 %v620_v18, %v636_v1  ;;  %v622_v9 = vadd.f32 %v1932_v57, %v602_v2  ;;  %v584_v62 = vmul.f32 %v1576_v58, %v1906_v10 }
 0x236   : > { %v623_v59 = vadd.f32 %v1932_v57, %v603_v5  ;;  %v653_v13 = vmax.f32 %v621_v60, %v637_v63 }
 0x237   : > { %v663_v25 = vpack.c.bf16 %v652_v7, %v651_v4  ;;  %v638_v11 = vmul.f32 0.2, %v622_v9  ;;  %v604_v3 = vmul.f32 %v1927_v51, %v584_v62 }
 0x238   : > { %v639_v0 = vmul.f32 0.2, %v623_v59 }
 0x239   : > { %1448 = vmatmul.mubr.bf16.gmra.mxu1 %v663_v25  ;;  %v654_v31 = vmax.f32 %v622_v9, %v638_v11  ;;  %v624_v26 = vadd.f32 %v1932_v57, %v604_v3  ;;  %v1985_v57 = vld [vmem:[%s2268_s4] sm:$0x1f] }
 0x23a   : > { %v655_v16 = vmax.f32 %v623_v59, %v639_v0  ;;  %v685_v8 = vrot.slane %v1985_v57, %v260_v30 }
 0x23b   : > { %v664_v15 = vpack.c.bf16 %v654_v31, %v653_v13  ;;  %v640_v6 = vmul.f32 0.2, %v624_v26 }
 0x23d   : > { %1451 = vmatprep.mubr.bf16.mxu1 %v664_v15  ;;  %v656_v17 = vmax.f32 %v624_v26, %v640_v6 }
 0x23f   : > { %v665_v19 = vpack.c.bf16 %v656_v17, %v655_v16 }
 0x241   : > { %1452 = vmatmul.mubr.bf16.gmra.mxu1 %v665_v19 }
 0x2e9   : > { %v1441_v10 = vpop.f32.mrf.mxu1 }
 0x2ea   : > { %v2015_v61 = vadd.f32 %v1441_v10, %v685_v8 }
 0x2eb   : > { %v768_v20 = vpop.f32.mrf.mxu1 }
 0x2ec   : > { %v2023_v4 = vadd.f32 %v768_v20, %v685_v8  ;;  %v837_v9 = vsel %vm286_vm0, %v2015_v61, 0.0 }
 0x2ed   : > { %v1442_v21 = vpop.f32.mrf.mxu1 }
 0x2ee   : > { %v2025_v5 = vadd.f32 %v1442_v21, %v685_v8  ;;  %v831_v59 = vsel %vm286_vm0, %v2023_v4, 0.0 }
 0x2ef   : > { %v771_v22 = vpop.f32.mrf.mxu1 }
 0x2f0   : > { %v2031_v63 = vadd.f32 %v771_v22, %v685_v8  ;;  %v840_v62 = vsel %vm286_vm0, %v2025_v5, 0.0 }
 0x2f1   : > { %v1445_v23 = vpop.f32.mrf.mxu1 }
 0x2f2   : > { %v1999_v50 = vadd.f32 %v1445_v23, %v685_v8  ;;  %v834_v25 = vsel %vm286_vm0, %v2031_v63, 0.0 }
 0x2f3   : > { %v784_v36 = vpop.f32.mrf.mxu1 }
 0x2f4   : > { %v2007_v18 = vadd.f32 %v784_v36, %v685_v8  ;;  %v849_v55 = vsel %vm286_vm0, %v1999_v50, 0.0 }
 0x2f5   : > { %v1446_v51 = vpop.f32.mrf.mxu1 }
 0x2f6   : > { %v2009_v54 = vadd.f32 %v1446_v51, %v685_v8  ;;  %v843_v58 = vsel %vm286_vm0, %v2007_v18, 0.0 }
 0x2f7   : > { %v787_v24 = vpop.f32.mrf.mxu1 }
 0x2f8   : > { %v2017_v1 = vadd.f32 %v787_v24, %v685_v8  ;;  %v852_v2 = vsel %vm286_vm0, %v2009_v54, 0.0 }
 0x2f9   : > { %v1449_v12 = vpop.f32.mrf.mxu1 }
 0x2fa   : > { %v809_v42 = vadd.f32 %v1449_v12, %v685_v8  ;;  %v846_v7 = vsel %vm286_vm0, %v2017_v1, 0.0 }
 0x2fb   : > { %v800_v37 = vpop.f32.mrf.mxu1 }
 0x2fc   : > { %v1993_v47 = vadd.f32 %v800_v37, %v685_v8  ;;  %v861_v49 = vsel %vm286_vm0, %v809_v42, 0.0 }
 0x2fd   : > { %v1450_v27 = vpop.f32.mrf.mxu1 }
 0x2fe   : > { %v1995_v30 = vadd.f32 %v1450_v27, %v685_v8  ;;  %v855_v56 = vsel %vm286_vm0, %v1993_v47, 0.0 }
 0x2ff   : > { %v803_v28 = vpop.f32.mrf.mxu1 }
 0x300   : > { %v2001_v52 = vadd.f32 %v803_v28, %v685_v8  ;;  %v864_v53 = vsel %vm286_vm0, %v1995_v30, 0.0 }
 0x301   : > { %v1453_v32 = vpop.f32.mrf.mxu1 }
 0x302   : > { %v825_v33 = vadd.f32 %v1453_v32, %v685_v8  ;;  %v858_v60 = vsel %vm286_vm0, %v2001_v52, 0.0 }
 0x303   : > { %v816_v34 = vpop.f32.mrf.mxu1 }
 0x304   : > { %v817_v35 = vadd.f32 %v816_v34, %v685_v8  ;;  %v873_v38 = vsel %vm286_vm0, %v825_v33, 0.0 }
 0x305   : > { %874 = vadd.xlane.f32.xlu1 %v873_v38  ;;  %v1454_v39 = vpop.f32.mrf.mxu1 }
 0x306   : > { %v828_v40 = vadd.f32 %v1454_v39, %v685_v8  ;;  %v867_v14 = vsel %vm286_vm0, %v817_v35, 0.0 }
 0x307   : > { %v819_v45 = vpop.f32.mrf.mxu1 }
 0x308   : > { %v820_v46 = vadd.f32 %v819_v45, %v685_v8  ;;  %v876_v43 = vsel %vm286_vm0, %v828_v40, 0.0 }
 0x309   : > { %877 = vadd.xlane.f32.xlu0 %v876_v43  ;;  %868 = vadd.xlane.f32.xlu1 %v867_v14 }
 0x30a   : > { %v870_v48 = vsel %vm286_vm0, %v820_v46, 0.0 }
 0x30d   : > { %871 = vadd.xlane.f32.xlu0 %v870_v48  ;;  %862 = vadd.xlane.f32.xlu1 %v861_v49 }
 0x311   : > { %865 = vadd.xlane.f32.xlu0 %v864_v53  ;;  %856 = vadd.xlane.f32.xlu1 %v855_v56 }
 0x315   : > { %859 = vadd.xlane.f32.xlu0 %v858_v60  ;;  %850 = vadd.xlane.f32.xlu1 %v849_v55 }
 0x319   : > { %853 = vadd.xlane.f32.xlu0 %v852_v2  ;;  %844 = vadd.xlane.f32.xlu1 %v843_v58 }
 0x31d   : > { %847 = vadd.xlane.f32.xlu0 %v846_v7  ;;  %838 = vadd.xlane.f32.xlu1 %v837_v9 }
 0x321   : > { %841 = vadd.xlane.f32.xlu0 %v840_v62  ;;  %832 = vadd.xlane.f32.xlu1 %v831_v59 }
 0x325   : > { %835 = vadd.xlane.f32.xlu0 %v834_v25 }
 0x38e   : > { %v875_v11 = vpop.xlane.xlu1 %874 }
 0x38f   : > { %v894_v3 = vmul.f32 0.015625, %v875_v11 }
 0x391   : > { %v2039_v13 = vsub.f32 %v825_v33, %v894_v3 }
 0x392   : > { %v878_v31 = vpop.xlane.xlu0 %877  ;;  %v869_v26 = vpop.xlane.xlu1 %868 }
 0x393   : > { %v895_v0 = vmul.f32 0.015625, %v878_v31  ;;  %v892_v15 = vmul.f32 0.015625, %v869_v26  ;;  %v926_v6 = vmul.f32 %v2039_v13, %v2039_v13 }
 0x395   : > { %v2043_v16 = vsub.f32 %v828_v40, %v895_v0  ;;  %v2045_v17 = vsub.f32 %v817_v35, %v892_v15  ;;  %v970_v19 = vsel %vm286_vm0, %v926_v6, 0.0 }
 0x396   : > { %v872_v10 = vpop.xlane.xlu0 %871  ;;  %971 = vadd.xlane.f32.xlu1 %v970_v19  ;;  %v863_v20 = vpop.xlane.xlu1 %862 }
 0x397   : > { %v893_v21 = vmul.f32 0.015625, %v872_v10  ;;  %v890_v22 = vmul.f32 0.015625, %v863_v20  ;;  %v927_v23 = vmul.f32 %v2043_v16, %v2043_v16  ;;  %v924_v36 = vmul.f32 %v2045_v17, %v2045_v17 }
 0x399   : > { %v2052_v51 = vsub.f32 %v820_v46, %v893_v21  ;;  %v2054_v24 = vsub.f32 %v809_v42, %v890_v22  ;;  %v973_v12 = vsel %vm286_vm0, %v927_v23, 0.0  ;;  %v964_v37 = vsel %vm286_vm0, %v924_v36, 0.0 }
 0x39a   : > { %974 = vadd.xlane.f32.xlu0 %v973_v12  ;;  %v866_v27 = vpop.xlane.xlu0 %865  ;;  %965 = vadd.xlane.f32.xlu1 %v964_v37  ;;  %v857_v28 = vpop.xlane.xlu1 %856 }
 0x39b   : > { %v891_v8 = vmul.f32 0.015625, %v866_v27  ;;  %v888_v32 = vmul.f32 0.015625, %v857_v28  ;;  %v925_v33 = vmul.f32 %v2052_v51, %v2052_v51  ;;  %v922_v34 = vmul.f32 %v2054_v24, %v2054_v24 }
 0x39d   : > { %v2063_v35 = vsub.f32 %v1995_v30, %v891_v8  ;;  %v2066_v38 = vsub.f32 %v1993_v47, %v888_v32  ;;  %v967_v39 = vsel %vm286_vm0, %v925_v33, 0.0  ;;  %v958_v40 = vsel %vm286_vm0, %v922_v34, 0.0 }
 0x39e   : > { %968 = vadd.xlane.f32.xlu0 %v967_v39  ;;  %v860_v45 = vpop.xlane.xlu0 %859  ;;  %959 = vadd.xlane.f32.xlu1 %v958_v40  ;;  %v851_v42 = vpop.xlane.xlu1 %850  ;;  %v1671_v34 = vmov 0.0  }
 0x39f   : > { %v889_v46 = vmul.f32 0.015625, %v860_v45  ;;  %v886_v43 = vmul.f32 0.015625, %v851_v42  ;;  %v923_v14 = vmul.f32 %v2063_v35, %v2063_v35  ;;  %v920_v30 = vmul.f32 %v2066_v38, %v2066_v38  ;;  %1455 = vmatprep.subr.mxu0 %v1671_v34  ;;  %1487 = vmatprep.mubr.msk.f32.mxu0 %vm1672_vm1, %v1671_v34 }
 0x3a1   : > { %v2075_v48 = vsub.f32 %v2001_v52, %v889_v46  ;;  %v2078_v47 = vsub.f32 %v1999_v50, %v886_v43  ;;  %v961_v49 = vsel %vm286_vm0, %v923_v14, 0.0  ;;  %v952_v53 = vsel %vm286_vm0, %v920_v30, 0.0 }
 0x3a2   : > { %962 = vadd.xlane.f32.xlu0 %v961_v49  ;;  %v854_v56 = vpop.xlane.xlu0 %853  ;;  %953 = vadd.xlane.f32.xlu1 %v952_v53  ;;  %v845_v60 = vpop.xlane.xlu1 %844 }
 0x3a3   : > { %v887_v55 = vmul.f32 0.015625, %v854_v56  ;;  %v884_v2 = vmul.f32 0.015625, %v845_v60  ;;  %v921_v58 = vmul.f32 %v2075_v48, %v2075_v48  ;;  %v918_v52 = vmul.f32 %v2078_v47, %v2078_v47 }
 0x3a5   : > { %v2087_v7 = vsub.f32 %v2009_v54, %v887_v55  ;;  %v2090_v50 = vsub.f32 %v2007_v18, %v884_v2  ;;  %v955_v9 = vsel %vm286_vm0, %v921_v58, 0.0  ;;  %v946_v62 = vsel %vm286_vm0, %v918_v52, 0.0 }
 0x3a6   : > { %956 = vadd.xlane.f32.xlu0 %v955_v9  ;;  %v848_v59 = vpop.xlane.xlu0 %847  ;;  %947 = vadd.xlane.f32.xlu1 %v946_v62  ;;  %v839_v25 = vpop.xlane.xlu1 %838 }
 0x3a7   : > { %v885_v11 = vmul.f32 0.015625, %v848_v59  ;;  %v882_v3 = vmul.f32 0.015625, %v839_v25  ;;  %v919_v31 = vmul.f32 %v2087_v7, %v2087_v7  ;;  %v916_v54 = vmul.f32 %v2090_v50, %v2090_v50 }
 0x3a9   : > { %v2099_v26 = vsub.f32 %v2017_v1, %v885_v11  ;;  %v2102_v18 = vsub.f32 %v2015_v61, %v882_v3  ;;  %v949_v0 = vsel %vm286_vm0, %v919_v31, 0.0  ;;  %v940_v15 = vsel %vm286_vm0, %v916_v54, 0.0 }
 0x3aa   : > { %950 = vadd.xlane.f32.xlu0 %v949_v0  ;;  %v842_v6 = vpop.xlane.xlu0 %841  ;;  %941 = vadd.xlane.f32.xlu1 %v940_v15  ;;  %v833_v19 = vpop.xlane.xlu1 %832  ;;  %v2136_v0 = vrot.slane %v1985_v57, %v587_v41 }
 0x3ab   : > { %v883_v10 = vmul.f32 0.015625, %v842_v6  ;;  %v880_v20 = vmul.f32 0.015625, %v833_v19  ;;  %v917_v21 = vmul.f32 %v2099_v26, %v2099_v26  ;;  %v914_v1 = vmul.f32 %v2102_v18, %v2102_v18 }
 0x3ad   : > { %v2111_v22 = vsub.f32 %v2025_v5, %v883_v10  ;;  %v2114_v61 = vsub.f32 %v2023_v4, %v880_v20  ;;  %v943_v23 = vsel %vm286_vm0, %v917_v21, 0.0  ;;  %v934_v36 = vsel %vm286_vm0, %v914_v1, 0.0 }
 0x3ae   : > { %944 = vadd.xlane.f32.xlu0 %v943_v23  ;;  %v836_v12 = vpop.xlane.xlu0 %835  ;;  %935 = vadd.xlane.f32.xlu1 %v934_v36  ;;  %v2142_v20 = vrot.slane %v1985_v57, %v607_v44 }
 0x3af   : > { %v881_v37 = vmul.f32 0.015625, %v836_v12  ;;  %v915_v27 = vmul.f32 %v2111_v22, %v2111_v22  ;;  %v912_v28 = vmul.f32 %v2114_v61, %v2114_v61 }
 0x3b1   : > { %v2123_v5 = vsub.f32 %v2031_v63, %v881_v37  ;;  %v937_v4 = vsel %vm286_vm0, %v915_v27, 0.0  ;;  %v928_v8 = vsel %vm286_vm0, %v912_v28, 0.0  ;;  %v1673_v63 = vmov 0  }
 0x3b2   : > { %938 = vadd.xlane.f32.xlu0 %v937_v4  ;;  %929 = vadd.xlane.f32.xlu1 %v928_v8 }
 0x3b3   : > { %v913_v32 = vmul.f32 %v2123_v5, %v2123_v5  ;;  %1532 = vset.pattern.permute.xlu0 %v1673_v63 }
 0x3b5   : > { %v931_v33 = vsel %vm286_vm0, %v913_v32, 0.0 }
 0x3b6   : > { %932 = vadd.xlane.f32.xlu0 %v931_v33 }
 0x3cc   : > { %1114 = vperm.xlu0 %1532, %v1985_v57  }
 0x41f   : > { %v972_v39 = vpop.xlane.xlu1 %971 }
 0x420   : > { %v990_v40 = vmul.f32 0.015625, %v972_v39 }
 0x422   : > { %v1006_v45 = vadd.f32 1e-05, %v990_v40 }
 0x423   : > { %v975_v42 = vpop.xlane.xlu0 %974  ;;  %v966_v46 = vpop.xlane.xlu1 %965 }
 0x424   : > { %1577 = vrsqrt.f32 %v1006_v45  ;;  %v991_v43 = vmul.f32 0.015625, %v975_v42  ;;  %v988_v14 = vmul.f32 0.015625, %v966_v46 }
 0x426   : > { %v1007_v30 = vadd.f32 1e-05, %v991_v43  ;;  %v1004_v49 = vadd.f32 1e-05, %v988_v14 }
 0x427   : > { %v969_v53 = vpop.xlane.xlu0 %968  ;;  %v960_v56 = vpop.xlane.xlu1 %959 }
 0x428   : > { %1579 = vrsqrt.f32 %v1007_v30  ;;  %v989_v60 = vmul.f32 0.015625, %v969_v53  ;;  %v986_v2 = vmul.f32 0.015625, %v960_v56 }
 0x429   : > { %1581 = vrsqrt.f32 %v1004_v49 }
 0x42a   : > { %v1005_v55 = vadd.f32 1e-05, %v989_v60  ;;  %v1002_v9 = vadd.f32 1e-05, %v986_v2 }
 0x42b   : > { %v963_v58 = vpop.xlane.xlu0 %962  ;;  %v954_v59 = vpop.xlane.xlu1 %953 }
 0x42c   : > { %1583 = vrsqrt.f32 %v1005_v55  ;;  %v987_v52 = vmul.f32 0.015625, %v963_v58  ;;  %v984_v31 = vmul.f32 0.015625, %v954_v59 }
 0x42e   : > { %v1003_v62 = vadd.f32 1e-05, %v987_v52  ;;  %v1000_v10 = vadd.f32 1e-05, %v984_v31 }
 0x42f   : > { %v957_v25 = vpop.xlane.xlu0 %956  ;;  %v948_v1 = vpop.xlane.xlu1 %947 }
 0x430   : > { %1585 = vrsqrt.f32 %v1003_v62  ;;  %v985_v11 = vmul.f32 0.015625, %v957_v25 }
 0x431   : > { %v1578_v3 = vpop.eup %1577  ;;  %1587 = vrsqrt.f32 %v1002_v9 }
 0x432   : > { %v1001_v54 = vadd.f32 1e-05, %v985_v11  ;;  %v1038_v15 = vmul.f32 %v1578_v3, %v2039_v13  ;;  %v982_v13 = vmul.f32 0.015625, %v948_v1 }
 0x433   : > { %v951_v6 = vpop.xlane.xlu0 %950  ;;  %v942_v45 = vpop.xlane.xlu1 %941 }
 0x434   : > { %1589 = vrsqrt.f32 %v1001_v54  ;;  %v983_v23 = vmul.f32 0.015625, %v951_v6  ;;  %v1058_v12 = vmul.f32 %v2136_v0, %v1038_v15 }
 0x435   : > { %v1580_v19 = vpop.eup %1579  ;;  %1591 = vrsqrt.f32 %v1000_v10 }
 0x436   : > { %v1582_v21 = vpop.eup %1581  ;;  %v1039_v36 = vmul.f32 %v1580_v19, %v2043_v16  ;;  %v999_v28 = vadd.f32 1e-05, %v983_v23  ;;  %v1078_v4 = vadd.f32 %v2142_v20, %v1058_v12  ;;  %v998_v16 = vadd.f32 1e-05, %v982_v13 }
 0x437   : > { %v1036_v27 = vmul.f32 %v1582_v21, %v2045_v17  ;;  %v945_v29 = vpop.xlane.xlu0 %944  ;;  %v936_v59 = vpop.xlane.xlu1 %935 }
 0x438   : > { %v1059_v41 = vmul.f32 %v2136_v0, %v1039_v36  ;;  %v981_v63 = vmul.f32 0.015625, %v945_v29  ;;  %1593 = vrsqrt.f32 %v999_v28  ;;  %v1094_v17 = vmul.f32 0.2, %v1078_v4 }
 0x439   : > { %v1584_v37 = vpop.eup %1583  ;;  %v1056_v40 = vmul.f32 %v2136_v0, %v1036_v27  ;;  %1595 = vrsqrt.f32 %v998_v16 }
 0x43a   : > { %v1079_v44 = vadd.f32 %v2142_v20, %v1059_v41  ;;  %v1037_v8 = vmul.f32 %v1584_v37, %v2052_v51  ;;  %v980_v51 = vmul.f32 0.015625, %v942_v45  ;;  %v997_v30 = vadd.f32 1e-05, %v981_v63 }
 0x43b   : > { %v1076_v49 = vadd.f32 %v2142_v20, %v1056_v40  ;;  %v939_v53 = vpop.xlane.xlu0 %938  ;;  %v1110_v56 = vmax.f32 %v1078_v4, %v1094_v17  ;;  %v930_v37 = vpop.xlane.xlu1 %929 }
 0x43c   : > { %v1095_v32 = vmul.f32 0.2, %v1079_v44  ;;  %v1057_v39 = vmul.f32 %v2136_v0, %v1037_v8  ;;  %v996_v58 = vadd.f32 1e-05, %v980_v51  ;;  %1597 = vrsqrt.f32 %v997_v30 }
 0x43d   : > { %v1586_v33 = vpop.eup %1585  ;;  %v979_v52 = vmul.f32 0.015625, %v939_v53  ;;  %v1092_v9 = vmul.f32 0.2, %v1076_v49  ;;  %v976_v29 = vmul.f32 0.015625, %v930_v37 }
 0x43e   : > { %v1111_v42 = vmax.f32 %v1079_v44, %v1095_v32  ;;  %v1035_v46 = vmul.f32 %v1586_v33, %v2063_v35  ;;  %v1588_v43 = vpop.eup %1587  ;;  %v1077_v14 = vadd.f32 %v2142_v20, %v1057_v39  ;;  %1599 = vrsqrt.f32 %v996_v58 }
 0x43f   : > { %v1034_v2 = vmul.f32 %v1588_v43, %v2054_v24  ;;  %v978_v24 = vmul.f32 0.015625, %v936_v59  ;;  %v995_v54 = vadd.f32 1e-05, %v979_v52  ;;  %v933_v6 = vpop.xlane.xlu0 %932  ;;  %v1108_v19 = vmax.f32 %v1076_v49, %v1092_v9 }
 0x440   : > { %1456 = vmatpush3.xpose.msk.msra.mxu0 %vm286_vm0, %v1111_v42  ;;  %v1093_v60 = vmul.f32 0.2, %v1077_v14  ;;  %v1055_v55 = vmul.f32 %v2136_v0, %v1035_v46  ;;  %v977_v36 = vmul.f32 0.015625, %v933_v6  ;;  %v992_v39 = vadd.f32 1e-05, %v976_v29 }
 0x441   : > { %1457 = vmatprep.subr.mxu0 %v1671_v34  ;;  %v1590_v35 = vpop.eup %1589  ;;  %v1054_v3 = vmul.f32 %v2136_v0, %v1034_v2  ;;  %1601 = vrsqrt.f32 %v995_v54 }
 0x442   : > { %v1592_v62 = vpop.eup %1591  ;;  %v1109_v25 = vmax.f32 %v1077_v14, %v1093_v60  ;;  %v1075_v11 = vadd.f32 %v2142_v20, %v1055_v55  ;;  %v1033_v31 = vmul.f32 %v1590_v35, %v2075_v48  ;;  %v994_v48 = vadd.f32 1e-05, %v978_v24 }
 0x443   : > { %v1032_v15 = vmul.f32 %v1592_v62, %v2066_v38  ;;  %v1074_v21 = vadd.f32 %v2142_v20, %v1054_v3  ;;  %v993_v44 = vadd.f32 1e-05, %v977_v36 }
 0x444   : > { %1458 = vmatpush3.xpose.msk.msra.mxu0 %vm286_vm0, %v1110_v56  ;;  %v1091_v10 = vmul.f32 0.2, %v1075_v11  ;;  %v1053_v1 = vmul.f32 %v2136_v0, %v1033_v31  ;;  %1603 = vrsqrt.f32 %v994_v48 }
 0x445   : > { %1459 = vmatprep.subr.mxu0 %v1671_v34  ;;  %v1594_v23 = vpop.eup %1593  ;;  %v1052_v12 = vmul.f32 %v2136_v0, %v1032_v15  ;;  %v1090_v13 = vmul.f32 0.2, %v1074_v21  ;;  %1605 = vrsqrt.f32 %v993_v44 }
 0x446   : > { %v1596_v41 = vpop.eup %1595  ;;  %v1107_v38 = vmax.f32 %v1075_v11, %v1091_v10  ;;  %v1073_v27 = vadd.f32 %v2142_v20, %v1053_v1  ;;  %v1031_v28 = vmul.f32 %v1594_v23, %v2087_v7  ;;  %1607 = vrsqrt.f32 %v992_v39 }
 0x447   : > { %v1072_v4 = vadd.f32 %v2142_v20, %v1052_v12  ;;  %v1106_v32 = vmax.f32 %v1074_v21, %v1090_v13  ;;  %v1030_v63 = vmul.f32 %v1596_v41, %v2078_v47  ;;  %v1116_v12 = vrot.slane %v1985_v57, 3 }
 0x448   : > { %1460 = vmatpush3.xpose.msk.msra.mxu0 %vm286_vm0, %v1109_v25  ;;  %v1089_v33 = vmul.f32 0.2, %v1073_v27  ;;  %v1051_v16 = vmul.f32 %v2136_v0, %v1031_v28 }
 0x449   : > { %1461 = vmatprep.subr.mxu0 %v1671_v34  ;;  %v1598_v8 = vpop.eup %1597  ;;  %v1088_v7 = vmul.f32 0.2, %v1072_v4  ;;  %v1050_v17 = vmul.f32 %v2136_v0, %v1030_v63 }
 0x44a   : > { %v1105_v45 = vmax.f32 %v1073_v27, %v1089_v33  ;;  %v1071_v42 = vadd.f32 %v2142_v20, %v1051_v16  ;;  %v1029_v46 = vmul.f32 %v1598_v8, %v2099_v26 }
 0x44b   : > { %v1600_v40 = vpop.eup %1599  ;;  %v1104_v14 = vmax.f32 %v1072_v4, %v1088_v7  ;;  %v1070_v30 = vadd.f32 %v2142_v20, %v1050_v17 }
 0x44c   : > { %1462 = vmatpush3.xpose.msk.msra.mxu0 %vm286_vm0, %v1108_v19  ;;  %v1028_v47 = vmul.f32 %v1600_v40, %v2090_v50  ;;  %v1087_v51 = vmul.f32 0.2, %v1071_v42  ;;  %v1049_v49 = vmul.f32 %v2136_v0, %v1029_v46 }
 0x44d   : > { %1463 = vmatprep.subr.mxu0 %v1671_v34  ;;  %v1086_v60 = vmul.f32 0.2, %v1070_v30 }
 0x44e   : > { %v1602_v43 = vpop.eup %1601  ;;  %v1048_v26 = vmul.f32 %v2136_v0, %v1028_v47  ;;  %v1103_v56 = vmax.f32 %v1071_v42, %v1087_v51  ;;  %v1069_v55 = vadd.f32 %v2142_v20, %v1049_v49 }
 0x44f   : > { %v1027_v50 = vmul.f32 %v1602_v43, %v2111_v22  ;;  %v1102_v58 = vmax.f32 %v1070_v30, %v1086_v60 }
 0x450   : > { %1464 = vmatpush3.xpose.msk.msra.mxu0 %vm286_vm0, %v1107_v38  ;;  %v1068_v2 = vadd.f32 %v2142_v20, %v1048_v26  ;;  %v1085_v52 = vmul.f32 0.2, %v1069_v55 }
 0x451   : > { %1465 = vmatprep.subr.mxu0 %v1671_v34  ;;  %v1604_v53 = vpop.eup %1603  ;;  %v1047_v9 = vmul.f32 %v2136_v0, %v1027_v50 }
 0x452   : > { %v1606_v35 = vpop.eup %1605  ;;  %v1026_v62 = vmul.f32 %v1604_v53, %v2102_v18  ;;  %v1084_v59 = vmul.f32 0.2, %v1068_v2  ;;  %v1101_v22 = vmax.f32 %v1069_v55, %v1085_v52 }
 0x453   : > { %v1608_v25 = vpop.eup %1607  ;;  %v1067_v11 = vadd.f32 %v2142_v20, %v1047_v9  ;;  %v1025_v31 = vmul.f32 %v1606_v35, %v2123_v5 }
 0x454   : > { %1466 = vmatpush3.xpose.msk.msra.mxu0 %vm286_vm0, %v1106_v32  ;;  %v1046_v3 = vmul.f32 %v2136_v0, %v1026_v62  ;;  %v1100_v24 = vmax.f32 %v1068_v2, %v1084_v59  ;;  %v1024_v6 = vmul.f32 %v1608_v25, %v2114_v61 }
 0x455   : > { %1467 = vmatprep.subr.mxu0 %v1671_v34  ;;  %v1083_v54 = vmul.f32 0.2, %v1067_v11  ;;  %v1045_v15 = vmul.f32 %v2136_v0, %v1025_v31 }
 0x456   : > { %v1066_v18 = vadd.f32 %v2142_v20, %v1046_v3  ;;  %v1044_v21 = vmul.f32 %v2136_v0, %v1024_v6 }
 0x457   : > { %v1099_v19 = vmax.f32 %v1067_v11, %v1083_v54  ;;  %v1065_v5 = vadd.f32 %v2142_v20, %v1045_v15 }
 0x458   : > { %1468 = vmatpush3.xpose.msk.msra.mxu0 %vm286_vm0, %v1105_v45  ;;  %v1082_v10 = vmul.f32 0.2, %v1066_v18  ;;  %v1064_v48 = vadd.f32 %v2142_v20, %v1044_v21  ;;  %v1115_v20 = vpop.permute.xlu0 %1114 }
 0x459   : > { %1469 = vmatprep.subr.mxu0 %v1671_v34  ;;  %v1081_v23 = vmul.f32 0.2, %v1065_v5  ;;  %v1117_v41 = vrot.slane %v1115_v20, 4 }
 0x45a   : > { %v1098_v1 = vmax.f32 %v1066_v18, %v1082_v10  ;;  %v1080_v36 = vmul.f32 0.2, %v1064_v48 }
 0x45b   : > { %v1097_v61 = vmax.f32 %v1065_v5, %v1081_v23 }
 0x45c   : > { %1470 = vmatpush3.xpose.msk.msra.mxu0 %vm286_vm0, %v1104_v14  ;;  %v1096_v0 = vmax.f32 %v1064_v48, %v1080_v36 }
 0x45d   : > { %1471 = vmatprep.subr.mxu0 %v1671_v34 }
 0x460   : > { %1472 = vmatpush3.xpose.msk.msra.mxu0 %vm286_vm0, %v1103_v56 }
 0x461   : > { %1473 = vmatprep.subr.mxu0 %v1671_v34 }
 0x464   : > { %1474 = vmatpush3.xpose.msk.msra.mxu0 %vm286_vm0, %v1102_v58 }
 0x465   : > { %1475 = vmatprep.subr.mxu0 %v1671_v34 }
 0x468   : > { %1476 = vmatpush3.xpose.msk.msra.mxu0 %vm286_vm0, %v1101_v22 }
 0x469   : > { %1477 = vmatprep.subr.mxu0 %v1671_v34 }
 0x46c   : > { %1478 = vmatpush3.xpose.msk.msra.mxu0 %vm286_vm0, %v1100_v24 }
 0x46d   : > { %1479 = vmatprep.subr.mxu0 %v1671_v34 }
 0x470   : > { %1480 = vmatpush3.xpose.msk.msra.mxu0 %vm286_vm0, %v1099_v19 }
 0x471   : > { %1481 = vmatprep.subr.mxu0 %v1671_v34 }
 0x474   : > { %1482 = vmatpush3.xpose.msk.msra.mxu0 %vm286_vm0, %v1098_v1 }
 0x475   : > { %1483 = vmatprep.subr.mxu0 %v1671_v34 }
 0x478   : > { %1484 = vmatpush3.xpose.msk.msra.mxu0 %vm286_vm0, %v1097_v61 }
 0x479   : > { %1485 = vmatprep.subr.mxu0 %v1671_v34 }
 0x47c   : > { %1486 = vmatpush3.xpose.msk.msra.mxu0 %vm286_vm0, %v1096_v0 }
 0x47f   : > { %1488 = vmatmul.mubr.msk.f32.vlgmr.msra.gmra.mxu0 %vm286_vm0, %v1116_v12 }
 0x53f   : > { %v1235_v37 = vpop.f32.mrf.mxu0 }
 0x540   : > { %v1236_v38 = vadd.f32 %v1235_v37, %v1117_v41 }
 0x541   : > { %v1489_v34 = vpop.f32.mrf.mxu0 }
 0x542   : > { %1239 = vst [vmem:[%s217_s8] sm:$0x1] %v1236_v38 }
 0x543   : > { %1622 = shalt.err (!%p1619_p3)
}
 0x544   : > { %s1623_s7 = scalar_lea.hbm %s2229_s12, 16  ;;  %s1627_s25 = scalar_lea.hbm %s2269_s5, 32 }
 0x545   : > { %p1624_p4 = scmp.ne.s32.totalorder %s2229_s12, %s1623_s7  ;;  %p1628_p9 = scmp.lt.s32.totalorder %s2229_s12, %s2269_s5 }
 0x546   : > { %p1629_p10 = scmp.lt.s32.totalorder %s1627_s25, %s1623_s7 }
 0x547   : > { %p1625_p7 = pnand %p1624_p4, %p1740_p5 }
 0x548   : > { %p1630_p11 = por %p1629_p10, %p1628_p9 }
 0x549   : > { %p1626_p8 = pneg %p1625_p7 }
 0x54b   : > { %p1631_p12 = pnand %p1630_p11, %p1626_p8 }
 0x54d   : > { %1634 = shalt.err (!%p1631_p12)
}
 0x54e   : > { %1490 = dma.vmem_to_hbm [thread:$0]  (%p1740_p5), %s1254_s9, 16, %s2229_s12, %s1241_s13  }
 0x54f PF: > { %p1496_p13 = scmp.ge.s32.totalorder %s1669_s21, 2  ;;  %s1265_s6 = sand.u32 1, %s1657_s18  }
 0x550   : > { %s1266_s8 = scalar_lea.sflag [#allocation3], %s1265_s6 }
 0x551   : > { %p1493_p0 = pnand %p1496_p13, %p1744_p6 }
 0x553   : > { %p1494_p1 = pneg %p1493_p0 }
 0x555   : > { %1652 = dma.done.wait (%p1494_p1), %s1266_s8, 16  }
 0x556   : > { %1654 = vsyncadd (%p1494_p1), %s1266_s8, 4294967280  ;;  %p15_p2 = scmp.ge.s32.totalorder %s1728_s24, 4   ;;  %s2272_s18 = smov %s1661_s19 }
 0x557   : > { %s2273_s19 = smov %s1665_s20  ;;  %s2274_s20 = smov %s1738_s27 }
 0x558   : > { %s2275_s21 = smov %s1728_s24  ;;  %17 = sbr.rel (!%p15_p2) target bundleno = 3 (0x3), region = 75 }
 0x55d   :  { %1270 = vsyncpa [#allocation3], 1 }
 0x55e   :  { %1272 = vsyncpa [#allocation3 + $0x1], 1 }

</bundles_post_ra>
